<compile_context>
chip_gen: v7x
topology: tpu7x:2x2x1
jax: 0.10.0
libtpu: 0.0.40
codegen_flags: <defaults>
</compile_context>

<pallas_src>
import jax
import jax.numpy as jnp
from jax.experimental import pallas as pl
from jax.experimental.pallas import tpu as pltpu

# ----- module constants (ElectrostaticEnergy.__init__ defaults) -----
KE = 14.399645351950548
CUTON = 2.5
CUTOFF = 7.5
LR_CUTOFF = 10.0

KEHALF = KE / 2.0
CUTON16 = CUTON ** 16
CUT_RCONSTANT = LR_CUTOFF ** 15 / (LR_CUTOFF ** 16 + CUTON ** 16) ** (17.0 / 16.0)
CUT_CONSTANT = (1.0 / (CUTON ** 16 + LR_CUTOFF ** 16) ** (1.0 / 16.0)
                + LR_CUTOFF ** 16 / (LR_CUTOFF ** 16 + CUTON ** 16) ** (17.0 / 16.0))

PAD_RIJ = 2.0 * LR_CUTOFF  # padded pairs land beyond lr_cutoff -> contribute exactly 0


def _tpu_defaults():
    """Generation-aware (num_shards, vmem_limit_bytes, is_v7x)."""
    kind = ""
    try:
        kind = jax.devices()[0].device_kind.lower()
    except Exception:
        pass
    is_v7x = ("7x" in kind) or ("v7" in kind) or ("tpu7" in kind)
    # a 2-way pair split only pays on chips with 2 TensorCores per Pallas device
    dual_tc = (is_v7x
               or ("v5p" in kind) or (kind.strip() == "tpu v5")
               or ("v4" in kind and "lite" not in kind))
    if is_v7x:
        vmem_limit = 48 * 1024 * 1024          # 64 MiB physical on v7x -> stay under
    elif any(t in kind for t in ("v4", "v5", "v6")):
        vmem_limit = 64 * 1024 * 1024          # 128 MiB physical on v4/v5e/v5p/v6e
    else:
        vmem_limit = 32 * 1024 * 1024          # conservative default
    return (2 if dual_tc else 1), vmem_limit, is_v7x


def _electrostatic_kernel(q_ref, rij_ref, idx_ref, out_ref):
    # q_ref:   (1, N)      f32  atom charges (resident across all steps)
    # rij_ref: (1, TP)     f32  pair distances (current pair tile)
    # idx_ref: (1, 2*TP)   i32  [idx_i tile | idx_j tile] (current pair tile)
    # out_ref: (1, 1, N)   f32  per-shard accumulator (resident across pair steps)

    @pl.when(pl.program_id(1) == 0)
    def _init():
        out_ref[...] = jnp.zeros_like(out_ref)

    q = q_ref[...]
    rij = rij_ref[...]
    idx = idx_ref[...]

    n_atoms = q.shape[1]
    tp = rij.shape[1]

    # ---- single fused one-hot for both gathers (and reused for the scatter) ----
    # oh[n, k] = 1.0 iff idx[k] == n, where k runs over [idx_i tile | idx_j tile]
    atom_ids = jax.lax.broadcasted_iota(jnp.int32, (n_atoms, 2 * tp), 0)
    oh = (atom_ids == idx).astype(jnp.float32)                     # (N, 2*TP)

    # gather q[idx_i], q[idx_j] with one MXU dot, split by static lane slices
    q_both = jnp.dot(q, oh, preferred_element_type=jnp.float32)    # (1, 2*TP)
    q_i = q_both[:, :tp]
    q_j = q_both[:, tp:]
    fac = KEHALF * q_i * q_j

    # ---- switch_function(rij, cuton, cutoff) ----
    x = (rij - CUTON) / (CUTOFF - CUTON)
    ones = jnp.ones_like(x)
    zeros = jnp.zeros_like(x)

    def _switch_component(t):
        t_safe = jnp.where(t <= 0.0, ones, t)
        return jnp.where(t <= 0.0, zeros, jnp.exp(-1.0 / t_safe))

    fp = _switch_component(x)
    fm = _switch_component(1.0 - x)
    f = jnp.where(x <= 0.0, ones, jnp.where(x >= 1.0, zeros, fm / (fp + fm)))

    # ---- lr_cutoff branch of the forward pass ----
    coulomb = jnp.where(
        rij < LR_CUTOFF,
        1.0 / rij + rij / (LR_CUTOFF ** 2) - 2.0 / LR_CUTOFF,
        zeros,
    )
    r2 = rij * rij
    r4 = r2 * r2
    r8 = r4 * r4
    r16 = r8 * r8
    # (r^16 + cuton^16)^(-1/16) via rsqrt + 3 sqrts (EUP) instead of a float pow
    inv16 = jnp.sqrt(jnp.sqrt(jnp.sqrt(jax.lax.rsqrt(r16 + CUTON16))))
    damped = inv16 + (1.0 - f) * (CUT_RCONSTANT * rij) - CUT_CONSTANT

    e = fac * (f * damped + (1.0 - f) * coulomb)                   # (1, TP)

    # ---- scatter-add over idx_i: reuse the idx_i half of the gather one-hot.
    # (1, N) = e (1, TP) @ oh_i (N, TP)^T  -- standard NT (q @ k^T) MXU pattern,
    # so no O(N*TP) transpose and no separate scatter one-hot is built.
    oh_i = oh[:, :tp]                                              # static lane slice
    contrib = jax.lax.dot_general(
        e, oh_i, (((1,), (1,)), ((), ())),
        preferred_element_type=jnp.float32)                        # (1, N)
    out_ref[...] += contrib[None, :, :]


def electrostatic_energy(N: int, q, rij, idx_i, idx_j, *, pair_tile=None,
                         num_shards=None):
    """JAX/Pallas equivalent of ElectrostaticEnergy.forward."""
    P = rij.shape[0]

    # padded-pair zeroing invariant: rij = PAD_RIJ must give f == 0 and coulomb == 0
    assert PAD_RIJ >= CUTOFF and PAD_RIJ >= LR_CUTOFF

    shards, vmem_limit, is_v7x = _tpu_defaults()
    if num_shards is not None:
        shards = int(num_shards)

    n_pad = max(128, pl.cdiv(N, 128) * 128)

    if pair_tile is None:
        # per-step one-hot working set ~ 8 * n_pad * tp bytes; keep it to ~1/4
        # of the VMEM limit, and never pad small P up to a huge chunk.
        budget = vmem_limit // 4
        cap = max(128, min(2048, (budget // (8 * n_pad)) // 128 * 128))
        need = max(128, pl.cdiv(pl.cdiv(P, shards), 128) * 128)
        pair_tile = min(cap, need)
    tp = int(pair_tile)
    assert tp % 128 == 0

    chunk = shards * tp
    steps = max(1, pl.cdiv(P, chunk))
    p_pad = steps * chunk
    n_tiles = shards * steps

    # --- pad lane-dense; padded pairs contribute exactly 0, padded atoms q=0 ---
    q_row = jnp.zeros((1, n_pad), jnp.float32).at[0, :N].set(q.astype(jnp.float32))
    rij_row = jnp.full((1, p_pad), PAD_RIJ, jnp.float32).at[0, :P].set(
        rij.astype(jnp.float32))
    ii = jnp.zeros((p_pad,), jnp.int32).at[:P].set(idx_i.astype(jnp.int32))
    ij = jnp.zeros((p_pad,), jnp.int32).at[:P].set(idx_j.astype(jnp.int32))
    # tile-wise packing: block t of width 2*tp is [idx_i tile t | idx_j tile t]
    idx_cat = jnp.stack([ii.reshape(n_tiles, tp), ij.reshape(n_tiles, tp)], axis=1)
    idx_cat = idx_cat.reshape(1, n_tiles * 2 * tp)

    def pair_map(c, s):
        return (0, c * steps + s)

    if shards == 2 and is_v7x:
        # guarantee the 2-way split lands on both v7x TensorCores
        dims = (getattr(pltpu, "CORE_PARALLEL", "parallel"),
                getattr(pltpu, "ARBITRARY", "arbitrary"))
    else:
        dims = ("parallel", "arbitrary")

    out3 = pl.pallas_call(
        _electrostatic_kernel,
        out_shape=jax.ShapeDtypeStruct((shards, 1, n_pad), jnp.float32),
        grid=(shards, steps),
        in_specs=[
            pl.BlockSpec((1, n_pad), lambda c, s: (0, 0)),   # q (resident)
            pl.BlockSpec((1, tp), pair_map),                 # rij tile
            pl.BlockSpec((1, 2 * tp), pair_map),             # [idx_i | idx_j] tile
        ],
        out_specs=pl.BlockSpec((1, 1, n_pad), lambda c, s: (c, 0, 0)),
        compiler_params=pltpu.CompilerParams(
            dimension_semantics=dims,
            vmem_limit_bytes=vmem_limit,
        ),
    )(q_row, rij_row, idx_cat)

    # combine per-shard partial sums, drop atom padding
    return out3.reshape(shards, n_pad).sum(axis=0)[:N]


def _reference(N, q, rij, idx_i, idx_j):
    """Pure-JAX reference of the same forward pass (for validation)."""
    fac = KEHALF * q[idx_i] * q[idx_j]
    x = (rij - CUTON) / (CUTOFF - CUTON)
    ones = jnp.ones_like(x)
    zeros = jnp.zeros_like(x)

    def sc(t):
        t_ = jnp.where(t <= 0, ones, t)
        return jnp.where(t <= 0, zeros, jnp.exp(-ones / t_))

    fp, fm = sc(x), sc(1.0 - x)
    f = jnp.where(x <= 0, ones, jnp.where(x >= 1, zeros, fm / (fp + fm)))
    coulomb = jnp.where(rij < LR_CUTOFF,
                        1.0 / rij + rij / LR_CUTOFF ** 2 - 2.0 / LR_CUTOFF,
                        zeros)
    damped = ((rij ** 16 + CUTON16) ** (-1.0 / 16.0)
              + (1.0 - f) * CUT_RCONSTANT * rij - CUT_CONSTANT)
    e = (fac * (f * damped + (1.0 - f) * coulomb)).astype(jnp.float32)
    return jnp.zeros((N,), jnp.float32).at[idx_i].add(e)


if __name__ == "__main__":
    key = jax.random.PRNGKey(0)
    k_q, k_r, k_i, k_j = jax.random.split(key, 4)

    N = 40     # atoms
    P = 300    # pairs

    q = jax.random.normal(k_q, (N,), dtype=jnp.float32)
    rij = jax.random.uniform(k_r, (P,), dtype=jnp.float32, minval=0.5, maxval=12.0)
    idx_i = jax.random.randint(k_i, (P,), 0, N, dtype=jnp.int32)
    idx_j = jax.random.randint(k_j, (P,), 0, N, dtype=jnp.int32)

    # pair_tile=128 -> several pair steps per shard: exercises the resident
    # accumulator reduction (and the 2-way shard split on dual-TC chips).
    out = electrostatic_energy(N, q, rij, idx_i, idx_j, pair_tile=128)
    out = jax.block_until_ready(out)

    ref = _reference(N, q, rij, idx_i, idx_j)
    assert out.shape == (N,) and out.dtype == jnp.float32
    assert jnp.allclose(out, ref, rtol=1e-5, atol=1e-4), (
        float(jnp.max(jnp.abs(out - ref))))

    print("KERNEL_OK")
</pallas_src>

<mosaic_0001>
module attributes {stable_mosaic.version = 11 : i64} {
  func.func @_electrostatic_kernel(%arg0: i32, %arg1: i32, %arg2: memref<1x128xf32, #tpu.memory_space<vmem>>, %arg3: memref<1x128xf32, #tpu.memory_space<vmem>>, %arg4: memref<1x256xi32, #tpu.memory_space<vmem>>, %arg5: memref<1x1x128xf32, #tpu.memory_space<vmem>>) attributes {dimension_semantics = [#tpu.dimension_semantics<parallel>, #tpu.dimension_semantics<arbitrary>], iteration_bounds = array<i64: 1, 3>, scalar_prefetch = 0 : i64, scratch_operands = 0 : i64, tpu.core_type = #tpu.core_type<tc>, window_params = [{pipeline_mode = #tpu.pipeline_mode<synchronous>, transform_indices = @transform_0, window_bounds = array<i64: 1, 128>}, {transform_indices = @transform_1, window_bounds = array<i64: 1, 128>}, {transform_indices = @transform_2, window_bounds = array<i64: 1, 256>}, {transform_indices = @transform_3, window_bounds = array<i64: 1, 1, 128>}]} {
    %c0_i32 = arith.constant 0 : i32
    %0 = arith.cmpi eq, %arg1, %c0_i32 : i32
    %1 = arith.extui %0 : i1 to i32
    %c0_i32_0 = arith.constant 0 : i32
    %2 = arith.cmpi ne, %1, %c0_i32_0 : i32
    scf.if %2 {
      %cst_36 = arith.constant 0.000000e+00 : f32
      %91 = vector.broadcast %cst_36 : f32 to vector<1x1x128xf32>
      %c0_37 = arith.constant 0 : index
      %c0_38 = arith.constant 0 : index
      %c0_39 = arith.constant 0 : index
      %92 = vector.load %arg5[%c0_37, %c0_38, %c0_39] : memref<1x1x128xf32, #tpu.memory_space<vmem>>, vector<1x1x128xf32>
      tpu.vector_store %arg5[%c0_37, %c0_38, %c0_39], %91 {strides = array<i32>} : memref<1x1x128xf32, #tpu.memory_space<vmem>>, vector<1x1x128xf32>,
    } else {
    }
    %c0 = arith.constant 0 : index
    %c0_1 = arith.constant 0 : index
    %3 = vector.load %arg2[%c0, %c0_1] : memref<1x128xf32, #tpu.memory_space<vmem>>, vector<1x128xf32>
    %c0_2 = arith.constant 0 : index
    %c0_3 = arith.constant 0 : index
    %4 = vector.load %arg3[%c0_2, %c0_3] : memref<1x128xf32, #tpu.memory_space<vmem>>, vector<1x128xf32>
    %c0_4 = arith.constant 0 : index
    %c0_5 = arith.constant 0 : index
    %5 = vector.load %arg4[%c0_4, %c0_5] : memref<1x256xi32, #tpu.memory_space<vmem>>, vector<1x256xi32>
    %6 = tpu.iota {dimensions = array<i32: 0>} : vector<128x256xi32>
    %7 = vector.broadcast %5 : vector<1x256xi32> to vector<128x256xi32>
    %8 = arith.cmpi eq, %6, %7 : vector<128x256xi32>
    %9 = arith.extui %8 : vector<128x256xi1> to vector<128x256xi32>
    %10 = arith.sitofp %9 : vector<128x256xi32> to vector<128x256xf32>
    %cst = arith.constant dense<0.000000e+00> : vector<1x256xf32>
    %11 = tpu.matmul %3, %10, %cst {dimension_numbers = #tpu.dot_dimension_numbers<[1], [0], [0], [1], [0, 0, 1, 1], [], []>} : vector<1x128xf32>, vector<128x256xf32>, vector<1x256xf32> -> vector<1x256xf32>
    %12 = vector.extract_strided_slice %11 {offsets = [0, 0], sizes = [1, 128], strides = [1, 1]} : vector<1x256xf32> to vector<1x128xf32>
    %13 = vector.extract_strided_slice %11 {offsets = [0, 128], sizes = [1, 128], strides = [1, 1]} : vector<1x256xf32> to vector<1x128xf32>
    %cst_6 = arith.constant 7.1998229 : f32
    %14 = vector.broadcast %cst_6 : f32 to vector<1x128xf32>
    %15 = arith.mulf %14, %12 : vector<1x128xf32>
    %16 = arith.mulf %15, %13 : vector<1x128xf32>
    %cst_7 = arith.constant 2.500000e+00 : f32
    %17 = vector.broadcast %cst_7 : f32 to vector<1x128xf32>
    %18 = arith.subf %4, %17 : vector<1x128xf32>
    %cst_8 = arith.constant 5.000000e+00 : f32
    %19 = vector.broadcast %cst_8 : f32 to vector<1x128xf32>
    %20 = arith.divf %18, %19 : vector<1x128xf32>
    %cst_9 = arith.constant 1.000000e+00 : f32
    %21 = vector.broadcast %cst_9 : f32 to vector<1x128xf32>
    %cst_10 = arith.constant 0.000000e+00 : f32
    %22 = vector.broadcast %cst_10 : f32 to vector<1x128xf32>
    %cst_11 = arith.constant 0.000000e+00 : f32
    %23 = vector.broadcast %cst_11 : f32 to vector<1x128xf32>
    %24 = arith.cmpf ole, %20, %23 : vector<1x128xf32>
    %25 = arith.select %24, %21, %20 : vector<1x128xi1>, vector<1x128xf32>
    %cst_12 = arith.constant 0.000000e+00 : f32
    %26 = vector.broadcast %cst_12 : f32 to vector<1x128xf32>
    %27 = arith.cmpf ole, %20, %26 : vector<1x128xf32>
    %cst_13 = arith.constant -1.000000e+00 : f32
    %28 = vector.broadcast %cst_13 : f32 to vector<1x128xf32>
    %29 = arith.divf %28, %25 : vector<1x128xf32>
    %30 = math.exp %29 : vector<1x128xf32>
    %31 = arith.select %27, %22, %30 : vector<1x128xi1>, vector<1x128xf32>
    %cst_14 = arith.constant 1.000000e+00 : f32
    %32 = vector.broadcast %cst_14 : f32 to vector<1x128xf32>
    %33 = arith.subf %32, %20 : vector<1x128xf32>
    %cst_15 = arith.constant 0.000000e+00 : f32
    %34 = vector.broadcast %cst_15 : f32 to vector<1x128xf32>
    %35 = arith.cmpf ole, %33, %34 : vector<1x128xf32>
    %36 = arith.select %35, %21, %33 : vector<1x128xi1>, vector<1x128xf32>
    %cst_16 = arith.constant 0.000000e+00 : f32
    %37 = vector.broadcast %cst_16 : f32 to vector<1x128xf32>
    %38 = arith.cmpf ole, %33, %37 : vector<1x128xf32>
    %cst_17 = arith.constant -1.000000e+00 : f32
    %39 = vector.broadcast %cst_17 : f32 to vector<1x128xf32>
    %40 = arith.divf %39, %36 : vector<1x128xf32>
    %41 = math.exp %40 : vector<1x128xf32>
    %42 = arith.select %38, %22, %41 : vector<1x128xi1>, vector<1x128xf32>
    %cst_18 = arith.constant 0.000000e+00 : f32
    %43 = vector.broadcast %cst_18 : f32 to vector<1x128xf32>
    %44 = arith.cmpf ole, %20, %43 : vector<1x128xf32>
    %cst_19 = arith.constant 1.000000e+00 : f32
    %45 = vector.broadcast %cst_19 : f32 to vector<1x128xf32>
    %46 = arith.cmpf oge, %20, %45 : vector<1x128xf32>
    %47 = arith.addf %31, %42 : vector<1x128xf32>
    %48 = arith.divf %42, %47 : vector<1x128xf32>
    %49 = arith.select %46, %22, %48 : vector<1x128xi1>, vector<1x128xf32>
    %50 = arith.select %44, %21, %49 : vector<1x128xi1>, vector<1x128xf32>
    %cst_20 = arith.constant 1.000000e+01 : f32
    %51 = vector.broadcast %cst_20 : f32 to vector<1x128xf32>
    %52 = arith.cmpf olt, %4, %51 : vector<1x128xf32>
    %cst_21 = arith.constant 1.000000e+00 : f32
    %53 = vector.broadcast %cst_21 : f32 to vector<1x128xf32>
    %54 = arith.divf %53, %4 : vector<1x128xf32>
    %cst_22 = arith.constant 1.000000e+02 : f32
    %55 = vector.broadcast %cst_22 : f32 to vector<1x128xf32>
    %56 = arith.divf %4, %55 : vector<1x128xf32>
    %57 = arith.addf %54, %56 : vector<1x128xf32>
    %cst_23 = arith.constant 2.000000e-01 : f32
    %58 = vector.broadcast %cst_23 : f32 to vector<1x128xf32>
    %59 = arith.subf %57, %58 : vector<1x128xf32>
    %60 = arith.select %52, %59, %22 : vector<1x128xi1>, vector<1x128xf32>
    %61 = arith.mulf %4, %4 : vector<1x128xf32>
    %62 = arith.mulf %61, %61 : vector<1x128xf32>
    %63 = arith.mulf %62, %62 : vector<1x128xf32>
    %64 = arith.mulf %63, %63 : vector<1x128xf32>
    %cst_24 = arith.constant 2328306.5 : f32
    %65 = vector.broadcast %cst_24 : f32 to vector<1x128xf32>
    %66 = arith.addf %64, %65 : vector<1x128xf32>
    %67 = math.rsqrt %66 : vector<1x128xf32>
    %68 = math.sqrt %67 : vector<1x128xf32>
    %69 = math.sqrt %68 : vector<1x128xf32>
    %70 = math.sqrt %69 : vector<1x128xf32>
    %cst_25 = arith.constant 1.000000e+00 : f32
    %71 = vector.broadcast %cst_25 : f32 to vector<1x128xf32>
    %72 = arith.subf %71, %50 : vector<1x128xf32>
    %cst_26 = arith.constant 0.00999999977 : f32
    %73 = vector.broadcast %cst_26 : f32 to vector<1x128xf32>
    %74 = arith.mulf %73, %4 : vector<1x128xf32>
    %75 = arith.mulf %72, %74 : vector<1x128xf32>
    %76 = arith.addf %70, %75 : vector<1x128xf32>
    %cst_27 = arith.constant 2.000000e-01 : f32
    %77 = vector.broadcast %cst_27 : f32 to vector<1x128xf32>
    %78 = arith.subf %76, %77 : vector<1x128xf32>
    %79 = arith.mulf %50, %78 : vector<1x128xf32>
    %cst_28 = arith.constant 1.000000e+00 : f32
    %80 = vector.broadcast %cst_28 : f32 to vector<1x128xf32>
    %81 = arith.subf %80, %50 : vector<1x128xf32>
    %82 = arith.mulf %81, %60 : vector<1x128xf32>
    %83 = arith.addf %79, %82 : vector<1x128xf32>
    %84 = arith.mulf %16, %83 : vector<1x128xf32>
    %85 = vector.extract_strided_slice %10 {offsets = [0, 0], sizes = [128, 128], strides = [1, 1]} : vector<128x256xf32> to vector<128x128xf32>
    %cst_29 = arith.constant dense<0.000000e+00> : vector<1x128xf32>
    %86 = tpu.matmul %84, %85, %cst_29 {dimension_numbers = #tpu.dot_dimension_numbers<[1], [1], [0], [0], [0, 0, 1, 0], [], []>} : vector<1x128xf32>, vector<128x128xf32>, vector<1x128xf32> -> vector<1x128xf32>
    %c0_30 = arith.constant 0 : index
    %c0_31 = arith.constant 0 : index
    %c0_32 = arith.constant 0 : index
    %87 = vector.load %arg5[%c0_30, %c0_31, %c0_32] : memref<1x1x128xf32, #tpu.memory_space<vmem>>, vector<1x1x128xf32>
    %88 = vector.shape_cast %86 : vector<1x128xf32> to vector<1x1x128xf32>
    %89 = arith.addf %87, %88 : vector<1x1x128xf32>
    %c0_33 = arith.constant 0 : index
    %c0_34 = arith.constant 0 : index
    %c0_35 = arith.constant 0 : index
    %90 = vector.load %arg5[%c0_33, %c0_34, %c0_35] : memref<1x1x128xf32, #tpu.memory_space<vmem>>, vector<1x1x128xf32>
    tpu.vector_store %arg5[%c0_33, %c0_34, %c0_35], %89 {strides = array<i32>} : memref<1x1x128xf32, #tpu.memory_space<vmem>>, vector<1x1x128xf32>,
    return
  }
  func.func @transform_0(%arg0: i32, %arg1: i32) -> (i32, i32) {
    %c0_i32 = arith.constant 0 : i32
    %c0_i32_0 = arith.constant 0 : i32
    %c0_i32_1 = arith.constant 0 : i32
    return %c0_i32, %c0_i32_0 : i32, i32
  }
  func.func @transform_1(%arg0: i32, %arg1: i32) -> (i32, i32) {
    %c3_i32 = arith.constant 3 : i32
    %0 = arith.muli %arg0, %c3_i32 : i32
    %1 = arith.addi %0, %arg1 : i32
    %c0_i32 = arith.constant 0 : i32
    %c0_i32_0 = arith.constant 0 : i32
    return %c0_i32, %1 : i32, i32
  }
  func.func @transform_2(%arg0: i32, %arg1: i32) -> (i32, i32) {
    %c3_i32 = arith.constant 3 : i32
    %0 = arith.muli %arg0, %c3_i32 : i32
    %1 = arith.addi %0, %arg1 : i32
    %c0_i32 = arith.constant 0 : i32
    %c0_i32_0 = arith.constant 0 : i32
    return %c0_i32, %1 : i32, i32
  }
  func.func @transform_3(%arg0: i32, %arg1: i32) -> (i32, i32, i32) {
    %c0_i32 = arith.constant 0 : i32
    %c0_i32_0 = arith.constant 0 : i32
    %c0_i32_1 = arith.constant 0 : i32
    return %arg0, %c0_i32, %c0_i32_0 : i32, i32, i32
  }
}

</mosaic_0001>

<bundles_post_ra>
// kernel: tpu_custom_call.1
= control target key start
LH: loop header
LB: loop body
LE: loop exit
PB: predicated region body
PF: predicated region fallthrough
CT: control target
= control target key end

     0   :  { %8 = vsyncpa [#allocation3], 0  ;;  %s1503_s0 = inlined_call_operand.hbm [shape: f32[1,128], index: 0, kind: input, shape index: {}]   ;;  %s1504_s1 = inlined_call_operand.hbm [shape: f32[1,384], index: 1, kind: input, shape index: {}]   ;;  %s1505_s2 = inlined_call_operand.vmem [shape: s32[1,768], index: 2, kind: input, shape index: {}]   ;;  %s1506_s3 = inlined_call_operand.hbm [shape: f32[1,1,128], index: 3, kind: output, shape index: {}]  }
   0x1   :  { %9 = vsyncpa [#allocation6], 0 }
   0x2   :  { %11 = vsyncpa [#allocation6 + $0x1], 0 }
   0x3   :  { %12 = vsyncpa [#allocation4], 0  ;;  %s1149_s12 = smov 0   ;;  %s1151_s13 = smov 0  }
   0x4   :  { %s1153_s14 = smov 0   ;;  %s1155_s15 = smov 0  }
   0x5   :  { %s1157_s16 = smov 0   ;;  %s1159_s17 = smov 0  }
   0x6 LB: > { %s675_s18 = sadd.s32 4294967295, %s1119_s17   ;;  %p75_p0 = scmp.ne.s32.totalorder %s1103_s13, %s1099_s12  ;;  %s1119_s17 = sphi %s1159_s17, %s18_s17   ;;  %s1115_s16 = sphi %s1157_s16, %s1540_s16   ;;  %s1111_s15 = sphi %s1155_s15, %s1539_s15   ;;  %s1107_s14 = sphi %s1153_s14, %s1538_s14   ;;  %s1103_s13 = sphi %s1151_s13, %s1537_s13   ;;  %s1099_s12 = sphi %s1149_s12, %s1536_s12  }
   0x7   : > { %p1181_p1 = scmp.eq.s32.totalorder %s675_s18, 0  ;;  %p676_p2 = scmp.ge.s32.totalorder %s1119_s17, 1 }
   0x8   : > { %p142_p3 = scmp.lt.s32.totalorder %s1119_s17, 4  ;;  %s1121_s22 = smov [#allocation2]  }
   0x9   : > { %s1511_s19 = scalar_select %p1181_p1, 1, 0 }
   0xa   : > { %p1189_p4 = por %p1181_p1, %p75_p0  ;;  %p1193_p5 = pnand %p676_p2, %p142_p3 }
   0xb   : > { %s155_s23 = sshll.u32 %s1121_s22, 4  ;;  %s27_s25 = sadd.s32 1, %s1115_s16  ;;  %s156_s23 = int_to_ptr.vmem [resolvable:$true] %s155_s23 }
   0xc   : > { %s1512_s20 = scalar_select %p1189_p4, 1, 0 }
   0xd   : > { %s1513_s21 = scalar_select %p1193_p5, 1, 0 }
   0xe   : > { %p889_p6 = pneg %p1193_p5  ;;  %s62_s26 = sadd.s32 1, %s1107_s14 }
   0xf   : > { %p1207_p8 = scmp.ge.s32.totalorder %s27_s25, 3  ;;  %s977_s30 = scalar_lea.hbm %s1503_s0, 16 }
  0x10   : > { %p1201_p7 = pnand %p889_p6, %p1181_p1  ;;  %p978_p9 = scmp.ne.s32.totalorder %s1503_s0, %s977_s30 }
  0x11   : > { %s1515_s27 = scalar_select %p1207_p8, 1, 0 }
  0x12   : > { %p979_p10 = pneg %p1201_p7  ;;  %p984_p13 = scmp.lt.u32.totalorder %s977_s30, %s1503_s0 }
  0x14   : > { %p980_p11 = pnand %p979_p10, %p978_p9 }
  0x16   : > { %p981_p12 = pneg %p980_p11 }
  0x18   : > { %p986_p0 = pnand %p984_p13, %p981_p12 }
  0x1a   : > { %989 = shalt.err (!%p986_p0)
}
  0x1b   : > { %s990_s8 = scalar_lea.vmem %s156_s23, 16  ;;  %s997_s9 = scalar_lea.vmem %s156_s23, 32 }
  0x1c   : > { %p991_p2 = scmp.ne.s32.totalorder %s156_s23, %s990_s8  ;;  %p998_p4 = scmp.lt.s32.totalorder %s156_s23, %s156_s23 }
  0x1d   : > { %p999_p1 = scmp.lt.s32.totalorder %s997_s9, %s990_s8 }
  0x1e   : > { %p993_p3 = pnand %p991_p2, %p979_p10 }
  0x1f   : > { %p1000_p5 = por %p999_p1, %p998_p4 }
  0x20   : > { %p994_p6 = pneg %p993_p3 }
  0x22   : > { %p1001_p8 = pnand %p1000_p5, %p994_p6 }
  0x24   : > { %1004 = shalt.err (!%p1001_p8)
}
  0x25   : > { %892 = dma.hbm_to_vmem [thread:$0]  (!%p1201_p7), %s1503_s0, 16, %s156_s23, [#allocation3]  }
  0x26   : > { %p1516_p9 = scmp.ne.s32.totalorder %s1515_s27, 0  ;;  %p69_p1 = scmp.ne.s32.totalorder %s1107_s14, %s1103_s13 }
  0x27   : > { %p70_p4 = scmp.eq.s32.totalorder %s1119_s17, 0  ;;  %p898_p5 = scmp.lt.s32.totalorder %s1119_s17, 3 }
  0x28   : > { %s1542_s25 = smov (%p1516_p9, %s27_s25), 0  ;;  %s166_s22 = sand.u32 1, %s1107_s14  }
  0x29   : > { %s59_s12 = ssub.s32 %s1115_s16, %s1542_s25  ;;  %p71_p10 = por %p70_p4, %p69_p1 }
  0x2a   : > { %p60_p8 = scmp.eq.s32.totalorder %s59_s12, 0  ;;  %s679_s24 = sshll.u32 %s1115_s16, 4 }
  0x2b   : > { %s1247_s4 = scalar_lea.hbm %s1504_s1, %s679_s24  ;;  %s169_s23 = scalar_lea.vmem [#allocation5], %s166_s22 }
  0x2c   : > { %s1242_s28 = scalar_select %p60_p8, %s1107_s14, %s62_s26  }
  0x2d   : > { %s178_s27 = sshll.u32 %s169_s23, 4  ;;  %p1251_p7 = pnand %p898_p5, %p71_p10  ;;  %s1249_s27 = int_to_ptr.vmem [resolvable:$true] %s178_s27 }
  0x2e   : > { %s167_s26 = scalar_lea.sflag [#allocation6], %s166_s22  ;;  %s1005_s6 = scalar_lea.hbm %s1247_s4, 16 }
  0x2f   : > { %p1006_p11 = scmp.ne.s32.totalorder %s1247_s4, %s1005_s6  ;;  %p1007_p12 = pneg %p1251_p7 }
  0x30   : > { %s1010_s9 = scalar_lea.hbm %s1504_s1, 48  ;;  %p1011_p2 = scmp.lt.u32.totalorder %s1247_s4, %s1504_s1 }
  0x31   : > { %p1008_p13 = pnand %p1007_p12, %p1006_p11  ;;  %p1012_p3 = scmp.lt.u32.totalorder %s1010_s9, %s1005_s6 }
  0x32   : > { %p1014_p9 = scmp.lt.u32.totalorder %s1005_s6, %s1247_s4 }
  0x33   : > { %p1009_p0 = pneg %p1008_p13  ;;  %p1013_p6 = por %p1012_p3, %p1011_p2 }
  0x35   : > { %p1015_p1 = por %p1014_p9, %p1013_p6 }
  0x37   : > { %p1016_p4 = pnand %p1015_p1, %p1009_p0 }
  0x39   : > { %1019 = shalt.err (!%p1016_p4)
}
  0x3a   : > { %s1020_s12 = scalar_lea.vmem %s1249_s27, 16  ;;  %s1122_s22 = smov [#allocation5]  }
  0x3b   : > { %p1021_p5 = scmp.ne.s32.totalorder %s1249_s27, %s1020_s12  ;;  %s1025_s24 = sshll.u32 %s1122_s22, 4  ;;  %s1026_s24 = int_to_ptr.vmem [resolvable:$false] %s1025_s24 }
  0x3c   : > { %s1027_s29 = scalar_lea.vmem %s1026_s24, 32  ;;  %p1028_p11 = scmp.lt.s32.totalorder %s1249_s27, %s1026_s24 }
  0x3d   : > { %p1023_p8 = pnand %p1021_p5, %p1007_p12  ;;  %p1029_p13 = scmp.lt.s32.totalorder %s1027_s29, %s1020_s12 }
  0x3f   : > { %p1024_p10 = pneg %p1023_p8  ;;  %p1030_p2 = por %p1029_p13, %p1028_p11 }
  0x41   : > { %p1031_p3 = pnand %p1030_p2, %p1024_p10 }
  0x43   : > { %1034 = shalt.err (!%p1031_p3)
}
  0x44   : > { %896 = dma.hbm_to_vmem [thread:$0]  (!%p1251_p7), %s1247_s4, 16, %s1249_s27, %s167_s26  }
  0x45   : > { %p1518_p0 = scmp.ne.s32.totalorder %s1513_s21, 0 }
  0x46   : > { %p1519_p12 = scmp.ne.s32.totalorder (!%p1518_p0), %s1511_s19, 0 }
  0x47   : > { %199 = sbr.rel (%p1518_p0) target bundleno = 580 (0x244), region = 32 }
  0x4e   : > { %1086 = dma.done.wait (%p1519_p12), [#allocation3], 16  }
  0x4f   : > { %1088 = vsyncadd (%p1519_p12), [#allocation3], 4294967280  ;;  %s205_s30 = sand.u32 1, %s1103_s13   ;;  %p1520_p6 = scmp.ne.s32.totalorder %s1512_s20, 0 }
  0x50   : > { %s206_s23 = scalar_lea.sflag [#allocation6], %s205_s30  ;;  %s1287_s6 = scalar_lea.vmem [#allocation5], %s205_s30 }
  0x51   : > { %1090 = dma.done.wait (%p1520_p6), %s206_s23, 16  }
  0x52   : > { %1092 = vsyncadd (%p1520_p6), %s206_s23, 4294967280  ;;  %s682_s21 = sshll.u32 %s1111_s15, 1  ;;  %p683_p9 = scmp.ne.s32.totalorder %s1111_s15, 0 }
  0x53   : > { %p236_p7 = scmp.lt.s32.totalorder %s682_s21, 5  ;;  %v1123_v0 = vmov (!%p683_p9), 0.0  }
  0x54   : > { %245 = sbr.rel (%p683_p9) target bundleno = 91 (0x5b), region = 44  ;;  %246 = vst [vmem:[#allocation7] sm:$0x1] (!%p683_p9), %v1123_v0 }
  0x55   : > { %s1544_s21 = smov (!%p236_p7, %s682_s21), 5 }
  0x56   : > { %s238_s19 = scalar_lea.vmem %s1505_s2, %s1544_s21 }
  0x5b PF: > { %v250_v1 = vlaneseq  ;;  %v1124_v2 = vmov 0.0   ;;  %v1125_v3 = vmov 0.0|0.0   ;;  %v249_v5 = vld [vmem:[%s238_s19] sm:$0x3]  ;;  %v1126_v15 = vmov 1.0|1.0  }
  0x5c   : > { %435 = vmatprep.mubr.f32.mxu0 %v1124_v2  ;;  %855 = vmatprep.subr.bf16.mxu1 %v1125_v3  ;;  %v247_v32 = vld [vmem:[#allocation2] sm:$0x1]  ;;  %v1438_v33 = vld [vmem:[%s1287_s6] sm:$0x1]  ;;  %s1128_s15 = smov [#allocation7]   ;;  %p1459_p1 = scmp.eq.s32.totalorder %s675_s18, 2 }
  0x5d   : > { %v1300_v4 = vshrl.u32 %v250_v1, 7  ;;  %v476_v34 = vmul.f32 %v1438_v33, %v1438_v33  ;;  %v748_v37 = vadd.f32 -2.5, %v1438_v33  ;;  %s594_s20 = sshll.u32 %s1128_s15, 4  ;;  %s595_s20 = int_to_ptr.vmem [resolvable:$true] %s594_s20 }
  0x5e   : > { %s1035_s26 = scalar_lea.vmem %s595_s20, 16  ;;  %s1041_s7 = scalar_lea.vmem %s595_s20, 32 }
  0x5f   : > { %v252_v6 = vadd.s32 8, %v1300_v4  ;;  %v273_v7 = vsub.s32 1, %v1300_v4  ;;  %v269_v8 = vsub.s32 0, %v1300_v4  ;;  %v253_v9 = vadd.s32 16, %v1300_v4  ;;  %p1036_p4 = scmp.ne.s32.totalorder %s595_s20, %s1035_s26  ;;  %p1042_p10 = scmp.lt.s32.totalorder %s595_s20, %s595_s20 }
  0x60   : > { %v254_v10 = vadd.s32 24, %v1300_v4  ;;  %v255_v13 = vadd.s32 32, %v1300_v4  ;;  %v256_v14 = vadd.s32 40, %v1300_v4  ;;  %v257_v16 = vadd.s32 48, %v1300_v4  ;;  %p1043_p11 = scmp.lt.s32.totalorder %s1041_s7, %s1035_s26 }
  0x61   : > { %v1307_v11 = vrot.slane %v249_v5, %v273_v7  ;;  %v1309_v12 = vrot.slane %v249_v5, %v269_v8  ;;  %v258_v17 = vadd.s32 56, %v1300_v4  ;;  %v259_v19 = vadd.s32 64, %v1300_v4  ;;  %p1037_p5 = pnand %p1036_p4, %p1459_p1 }
  0x62   : > { %v260_v20 = vadd.s32 72, %v1300_v4  ;;  %v261_v22 = vadd.s32 80, %v1300_v4  ;;  %v262_v23 = vadd.s32 88, %v1300_v4  ;;  %v263_v25 = vadd.s32 96, %v1300_v4  ;;  %p1044_p13 = por %p1043_p11, %p1042_p10 }
  0x63   : > { %vm276_vm0 = vcmp.eq.s32.totalorder %v1300_v4, %v1307_v11  ;;  %vm278_vm1 = vcmp.eq.s32.totalorder %v252_v6, %v1307_v11  ;;  %vm275_vm2 = vcmp.eq.s32.totalorder %v1300_v4, %v1309_v12  ;;  %vm277_vm3 = vcmp.eq.s32.totalorder %v252_v6, %v1309_v12  ;;  %p1038_p8 = pneg %p1037_p5 }
  0x64   : > { %vm823_vm4 = vmpackc.low %vm278_vm1, %vm276_vm0  ;;  %vm280_vm5 = vcmp.eq.s32.totalorder %v253_v9, %v1307_v11  ;;  %vm282_vm6 = vcmp.eq.s32.totalorder %v254_v10, %v1307_v11  ;;  %vm279_vm7 = vcmp.eq.s32.totalorder %v253_v9, %v1309_v12  ;;  %vm281_vm8 = vcmp.eq.s32.totalorder %v254_v10, %v1309_v12 }
  0x65   : > { %824 = vmatprep.subr.msk.bf16.mxu0 %vm823_vm4, %v1126_v15  ;;  %vm825_vm9 = vmpackc.low %vm277_vm3, %vm275_vm2  ;;  %vm284_vm10 = vcmp.eq.s32.totalorder %v255_v13, %v1307_v11  ;;  %vm286_vm11 = vcmp.eq.s32.totalorder %v256_v14, %v1307_v11  ;;  %vm283_vm15 = vcmp.eq.s32.totalorder %v255_v13, %v1309_v12  ;;  %vm285_vm0 = vcmp.eq.s32.totalorder %v256_v14, %v1309_v12  ;;  %p1045_p2 = pnand %p1044_p13, %p1038_p8 }
  0x66   : > { %826 = vmatpush1.bf16.msk.msra.mxu0 %vm825_vm9, %v1126_v15  ;;  %vm827_vm12 = vmpackc.low %vm282_vm6, %vm280_vm5  ;;  %857 = vmatpush3.bf16.xpose.msk.msra.mxu1 %vm825_vm9, %v1126_v15  ;;  %vm288_vm1 = vcmp.eq.s32.totalorder %v257_v16, %v1307_v11  ;;  %vm290_vm2 = vcmp.eq.s32.totalorder %v258_v17, %v1307_v11  ;;  %vm287_vm5 = vcmp.eq.s32.totalorder %v257_v16, %v1309_v12  ;;  %v264_v26 = vadd.s32 104, %v1300_v4 }
  0x67   : > { %828 = vmatprep.subr.msk.bf16.mxu0 %vm827_vm12, %v1126_v15  ;;  %vm1330_vm13 = vmpackc.low %vm281_vm8, %vm279_vm7  ;;  %858 = vmatprep.subr.bf16.mxu1 %v1125_v3  ;;  %vm289_vm6 = vcmp.eq.s32.totalorder %v258_v17, %v1309_v12  ;;  %vm292_vm7 = vcmp.eq.s32.totalorder %v259_v19, %v1307_v11  ;;  %vm294_vm8 = vcmp.eq.s32.totalorder %v260_v20, %v1307_v11  ;;  %v265_v28 = vadd.s32 112, %v1300_v4 }
  0x68   : > { %vm831_vm14 = vmpackc.low %vm286_vm11, %vm284_vm10  ;;  %vm291_vm11 = vcmp.eq.s32.totalorder %v259_v19, %v1309_v12  ;;  %vm293_vm12 = vcmp.eq.s32.totalorder %v260_v20, %v1309_v12  ;;  %v266_v29 = vadd.s32 120, %v1300_v4  ;;  %v477_v35 = vmul.f32 %v476_v34, %v476_v34 }
  0x69   : > { %vm1346_vm3 = vmpackc.low %vm285_vm0, %vm283_vm15  ;;  %vm298_vm15 = vcmp.eq.s32.totalorder %v262_v23, %v1307_v11  ;;  %v446_v39 = vmul.f32 0.2, %v748_v37  ;;  %v472_v9 = vmul.f32 0.01, %v1438_v33 }
  0x6a   : > { %830 = vmatpush1.bf16.msk.msra.mxu0 %vm1330_vm13, %v1126_v15  ;;  %vm835_vm4 = vmpackc.low %vm290_vm2, %vm288_vm1  ;;  %vm295_vm1 = vcmp.eq.s32.totalorder %v261_v22, %v1309_v12  ;;  %vm297_vm2 = vcmp.eq.s32.totalorder %v262_v23, %v1309_v12  ;;  %v478_v36 = vmul.f32 %v477_v35, %v477_v35 }
  0x6b   : > { %832 = vmatprep.subr.msk.bf16.mxu0 %vm831_vm14, %v1126_v15  ;;  %vm1360_vm9 = vmpackc.low %vm289_vm6, %vm287_vm5  ;;  %vm296_vm14 = vcmp.eq.s32.totalorder %v261_v22, %v1307_v11  ;;  %vm302_vm5 = vcmp.eq.s32.totalorder %v264_v26, %v1307_v11  ;;  %v454_v41 = vsub.f32 1.0, %v446_v39 }
  0x6c   : > { %vm839_vm10 = vmpackc.low %vm294_vm8, %vm292_vm7  ;;  %vm299_vm8 = vcmp.eq.s32.totalorder %v263_v25, %v1309_v12  ;;  %v479_v38 = vmul.f32 %v478_v36, %v478_v36 }
  0x6d   : > { %vm1378_vm0 = vmpackc.low %vm293_vm12, %vm291_vm11  ;;  %vm304_vm11 = vcmp.eq.s32.totalorder %v265_v28, %v1307_v11  ;;  %vm306_vm12 = vcmp.eq.s32.totalorder %v266_v29, %v1307_v11 }
  0x6e   : > { %834 = vmatpush1.bf16.msk.msra.mxu0 %vm1346_vm3, %v1126_v15  ;;  %860 = vmatpush3.bf16.xpose.msk.msra.mxu1 %vm1330_vm13, %v1126_v15  ;;  %vm843_vm13 = vmpackc.low %vm298_vm15, %vm296_vm14  ;;  %v480_v40 = vadd.f32 2328306.5, %v479_v38 }
  0x6f   : > { %836 = vmatprep.subr.msk.bf16.mxu0 %vm835_vm4, %v1126_v15  ;;  %861 = vmatprep.subr.bf16.mxu1 %v1125_v3  ;;  %vm300_vm4 = vcmp.eq.s32.totalorder %v263_v25, %v1307_v11  ;;  %vm1392_vm6 = vmpackc.low %vm297_vm2, %vm295_vm1  ;;  %vm1443_vm2 = vcmp.le.f32.partialorder %v454_v41, 0.0 }
  0x70   : > { %vm847_vm7 = vmpackc.low %vm302_vm5, %vm300_vm4  ;;  %957 = vrsqrt.f32 %v480_v40  ;;  %v456_v44 = vsel %vm1443_vm2, 1.0, %v454_v41 }
  0x71   : > { %vm851_vm15 = vmpackc.low %vm306_vm12, %vm304_vm11  ;;  %vm468_vm12 = vcmp.lt.f32.partialorder %v1438_v33, 10.0 }
  0x72   : > { %838 = vmatpush1.bf16.msk.msra.mxu0 %vm1360_vm9, %v1126_v15 }
  0x73   : > { %840 = vmatprep.subr.msk.bf16.mxu0 %vm839_vm10, %v1126_v15  ;;  %vm301_vm10 = vcmp.eq.s32.totalorder %v264_v26, %v1309_v12 }
  0x74   : > { %vm1408_vm14 = vmpackc.low %vm301_vm10, %vm299_vm8  ;;  %vm462_vm8 = vcmp.ge.f32.partialorder %v446_v39, 1.0 }
  0x76   : > { %842 = vmatpush1.bf16.msk.msra.mxu0 %vm1378_vm0, %v1126_v15  ;;  %863 = vmatpush3.bf16.xpose.msk.msra.mxu1 %vm1346_vm3, %v1126_v15  ;;  %vm305_vm3 = vcmp.eq.s32.totalorder %v266_v29, %v1309_v12  ;;  %v582_v29 = vld [vmem:[#allocation7] sm:$0x1] }
  0x77   : > { %844 = vmatprep.subr.msk.bf16.mxu0 %vm843_vm13, %v1126_v15  ;;  %864 = vmatprep.subr.bf16.mxu1 %v1125_v3  ;;  %vm303_vm13 = vcmp.eq.s32.totalorder %v265_v28, %v1309_v12 }
  0x78   : > { %vm853_vm1 = vmpackc.low %vm305_vm3, %vm303_vm13 }
  0x7a   : > { %846 = vmatpush1.bf16.msk.msra.mxu0 %vm1392_vm6, %v1126_v15  ;;  %v958_v45 = vpop.eup %957 }
  0x7b   : > { %848 = vmatprep.subr.msk.bf16.mxu0 %vm847_vm7, %v1126_v15  ;;  %vm484_vm4 = vcmp.eq.f32.partialorder %v958_v45, inf  ;;  %v487_v54 = vand.u32 2147483648, %v958_v45  ;;  %vm486_vm5 = vcmp.eq.f32.partialorder %v958_v45, 0.0 }
  0x7e   : > { %850 = vmatpush1.bf16.msk.msra.mxu0 %vm1408_vm14, %v1126_v15  ;;  %866 = vmatpush3.bf16.xpose.msk.msra.mxu1 %vm1360_vm9, %v1126_v15  ;;  %vm1127_vm9 = vmmov 0  }
  0x7f   : > { %852 = vmatprep.subr.msk.bf16.mxu0 %vm851_vm15, %v1126_v15  ;;  %867 = vmatprep.subr.bf16.mxu1 %v1125_v3 }
  0x80   : > { %820 = vmatprep.mubr.msk.f32.mxu1 %vm1127_vm9, %v1124_v2 }
  0x82   : > { %854 = vmatpush1.bf16.msk.msra.mxu0 %vm853_vm1, %v1126_v15 }
  0x85   : > { %436 = vmatmul.mubr.f32.vlgmr.msra.gmra.mrb[0].mxu0 %v247_v32 }
  0x86   : > { %869 = vmatpush3.bf16.xpose.msk.msra.mxu1 %vm1378_vm0, %v1126_v15  ;;  %vm447_vm0 = vcmp.le.f32.partialorder %v446_v39, 0.0 }
  0x87   : > { %870 = vmatprep.subr.bf16.mxu1 %v1125_v3  ;;  %v448_v43 = vsel %vm447_vm0, 1.0, %v446_v39 }
  0x88   : > { %959 = vrcp.f32 %v448_v43 }
  0x89   : > { %961 = vrcp.f32 %v456_v44 }
  0x8a   : > { %963 = vrsqrt.f32 %v958_v45 }
  0x8e   : > { %872 = vmatpush3.bf16.xpose.msk.msra.mxu1 %vm1392_vm6, %v1126_v15 }
  0x8f   : > { %873 = vmatprep.subr.bf16.mxu1 %v1125_v3 }
  0x92   : > { %v960_v46 = vpop.eup %959 }
  0x93   : > { %v962_v47 = vpop.eup %961  ;;  %v450_v48 = vmul.f32 -1.0, %v960_v46 }
  0x94   : > { %v964_v49 = vpop.eup %963  ;;  %v458_v50 = vmul.f32 -1.0, %v962_v47 }
  0x95   : > { %v451_v51 = vmul.f32 1.442695, %v450_v48  ;;  %v483_v52 = vmul.f32 %v964_v49, %v958_v45 }
  0x96   : > { %875 = vmatpush3.bf16.xpose.msk.msra.mxu1 %vm1408_vm14, %v1126_v15  ;;  %v459_v53 = vmul.f32 1.442695, %v458_v50 }
  0x97   : > { %876 = vmatprep.subr.bf16.mxu1 %v1125_v3  ;;  %965 = vpow2.f32 %v451_v51  ;;  %v485_v55 = vsel %vm484_vm4, %v958_v45, %v483_v52 }
  0x98   : > { %967 = vpow2.f32 %v459_v53  ;;  %v488_v56 = vsel %vm486_vm5, %v487_v54, %v485_v55 }
  0x99   : > { %969 = vrsqrt.f32 %v488_v56  ;;  %vm491_vm6 = vcmp.eq.f32.partialorder %v488_v56, inf  ;;  %v494_v0 = vand.u32 2147483648, %v488_v56  ;;  %vm493_vm7 = vcmp.eq.f32.partialorder %v488_v56, 0.0 }
  0x9e   : > { %878 = vmatpush3.bf16.xpose.msk.msra.mxu1 %vm853_vm1, %v1126_v15 }
  0xa1   : > { %v966_v57 = vpop.eup %965 }
  0xa2   : > { %v968_v58 = vpop.eup %967  ;;  %v453_v59 = vsel %vm447_vm0, 0.0, %v966_v57 }
  0xa3   : > { %v461_v60 = vsel %vm1443_vm2, 0.0, %v968_v58  ;;  %v970_v61 = vpop.eup %969 }
  0xa4   : > { %v463_v62 = vadd.f32 %v461_v60, %v453_v59  ;;  %v490_v63 = vmul.f32 %v970_v61, %v488_v56 }
  0xa6   : > { %971 = vrcp.f32 %v463_v62  ;;  %v492_v1 = vsel %vm491_vm6, %v488_v56, %v490_v63 }
  0xa7   : > { %v495_v2 = vsel %vm493_vm7, %v494_v0, %v492_v1 }
  0xa8   : > { %973 = vrsqrt.f32 %v495_v2  ;;  %vm498_vm10 = vcmp.eq.f32.partialorder %v495_v2, inf  ;;  %v501_v11 = vand.u32 2147483648, %v495_v2  ;;  %vm500_vm11 = vcmp.eq.f32.partialorder %v495_v2, 0.0 }
  0xa9   : > { %975 = vrcp.f32 %v1438_v33 }
  0xb0   : > { %v972_v3 = vpop.eup %971 }
  0xb1   : > { %v465_v4 = vmul.f32 %v972_v3, %v461_v60 }
  0xb2   : > { %v974_v6 = vpop.eup %973 }
  0xb3   : > { %v466_v5 = vsel %vm462_vm8, 0.0, %v465_v4  ;;  %v497_v8 = vmul.f32 %v974_v6, %v495_v2  ;;  %v976_v12 = vpop.eup %975 }
  0xb4   : > { %v467_v7 = vsel %vm447_vm0, 1.0, %v466_v5  ;;  %v473_v15 = vadd.f32 %v976_v12, %v472_v9 }
  0xb5   : > { %v503_v10 = vsub.f32 1.0, %v467_v7  ;;  %v499_v13 = vsel %vm498_vm10, %v495_v2, %v497_v8 }
  0xb6   : > { %v502_v16 = vsel %vm500_vm11, %v501_v11, %v499_v13  ;;  %v749_v18 = vadd.f32 -0.2, %v473_v15 }
  0xb7   : > { %v505_v14 = vmul.f32 %v503_v10, %v472_v9 }
  0xb8   : > { %v475_v20 = vsel %vm468_vm12, %v749_v18, 0.0 }
  0xb9   : > { %v506_v17 = vadd.f32 %v505_v14, %v502_v16  ;;  %v509_v22 = vmul.f32 %v503_v10, %v475_v20 }
  0xbb   : > { %v750_v19 = vadd.f32 -0.2, %v506_v17 }
  0xbd   : > { %v508_v21 = vmul.f32 %v750_v19, %v467_v7 }
  0xbf   : > { %v510_v26 = vadd.f32 %v509_v22, %v508_v21 }
 0x158   : > { %v437_v23 = vpop.f32.mrb[0].mxu0 }
 0x159   : > { %v442_v24 = vmul.f32 7.199823, %v437_v23  ;;  %v439_v25 = vpop.f32.mrb[1].mxu0 }
 0x15b   : > { %v443_v27 = vmul.f32 %v442_v24, %v439_v25 }
 0x15d   : > { %v511_v28 = vmul.f32 %v510_v26, %v443_v27 }
 0x15f   : > { %821 = vmatmul.mubr.f32.vlgmr.msra.gmra.mrb[0].mxu1 %v511_v28 }
 0x232   : > { %v578_v30 = vpop.f32.mrb[0].mxu1 }
 0x233   : > { %v583_v31 = vadd.f32 %v582_v29, %v578_v30  ;;  %v822_v32 = vpop.f32.mrb[1].mxu1 }
 0x235   : > { %584 = vst [vmem:[#allocation7] sm:$0x1] %v583_v31 }
 0x236   : > { %1048 = shalt.err (!%p1045_p2)
}
 0x237   : > { %s1049_s9 = scalar_lea.hbm %s1506_s3, 16 }
 0x238   : > { %p1050_p3 = scmp.ne.s32.totalorder %s1506_s3, %s1049_s9  ;;  %p1055_p6 = scmp.lt.u32.totalorder %s1049_s9, %s1506_s3 }
 0x23a   : > { %p1051_p0 = pnand %p1050_p3, %p1459_p1 }
 0x23c   : > { %p1052_p12 = pneg %p1051_p0 }
 0x23e   : > { %p1057_p7 = pnand %p1055_p6, %p1052_p12 }
 0x240   : > { %1060 = shalt.err (!%p1057_p7)
}
 0x241   : > { %886 = dma.vmem_to_hbm [thread:$0]  (%p1459_p1), %s595_s20, 16, %s1506_s3, [#allocation4]  }
 0x242   : > { %1094 = dma.done.wait (%p1459_p1), [#allocation4], 16  }
 0x243   : > { %1096 = vsyncadd (%p1459_p1), [#allocation4], 4294967280 }
 0x244 PF: > { %s18_s17 = sadd.s32 1, %s1119_s17   ;;  %s1536_s12 = smov %s1103_s13 }
 0x245   : > { %p15_p9 = scmp.ge.s32.totalorder %s18_s17, 5   ;;  %s1537_s13 = smov %s1107_s14 }
 0x246   : > { %s1538_s14 = smov %s1242_s28  ;;  %s1539_s15 = smov %s1115_s16 }
 0x247   : > { %s1540_s16 = smov %s1542_s25  ;;  %17 = sbr.rel (!%p15_p9) target bundleno = 6 (0x6), region = 82 }
 0x24e   :  { %607 = vsyncpa [#allocation3], 1 }
 0x24f   :  { %609 = vsyncpa [#allocation3 + $0x1], 1 }
 0x250   :  { %610 = vsyncpa [#allocation6], 1 }
 0x251   :  { %612 = vsyncpa [#allocation6 + $0x1], 1 }
 0x252   :  { %613 = vsyncpa [#allocation4], 1 }
 0x253   :  { %615 = vsyncpa [#allocation4 + $0x1], 1 }

</bundles_post_ra>
